<compile_context>
chip_gen: v7x
topology: tpu7x:2x2x1
jax: 0.10.0
libtpu: 0.0.40
codegen_flags: <defaults>
</compile_context>

<pallas_src>
import jax
import jax.numpy as jnp
from jax.experimental import pallas as pl
from jax.experimental.pallas import tpu as pltpu

LANE = 128


def _round_up(n: int, m: int) -> int:
    return ((n + m - 1) // m) * m


def _vanilla_mtl_kernel(x_ref, wb_ref, bb_ref, wh_ref, bh_ref, out_ref):
    """Fused backbone + all heads for one batch tile.

    x_ref  : (TM, D_in)   bf16   (no host lane padding; Mosaic pads in vregs)
    wb_ref : (D_in, H)    bf16   (resident)
    bb_ref : (1, H)       f32
    wh_ref : (H, N_pad)   bf16   (all head weights, 128-lane-aligned per head)
    bh_ref : (1, N_pad)   f32
    out_ref: (TM, N_pad)  f32/bf16 (all head outputs, lane-dense store)
    """
    # Backbone: MXU matmul in bf16 operands, f32 accumulation.
    rep = jnp.dot(x_ref[...], wb_ref[...], preferred_element_type=jnp.float32)
    rep = jnp.maximum(rep + bb_ref[...], 0.0)
    # `rep` never leaves VMEM (eval mode discards it); cast to bf16 once for
    # the single fused head matmul.
    preds = jnp.dot(rep.astype(jnp.bfloat16), wh_ref[...],
                    preferred_element_type=jnp.float32)
    out_ref[...] = (preds + bh_ref[...]).astype(out_ref.dtype)


def prepare_vanilla_mtl_params(backbone_params, head_params):
    """One-time parameter prep (hoisted out of the per-call forward).

    Casts weights to bf16 and concatenates all head weights/biases into one
    slab whose per-head column offsets are 128-lane aligned, so the wrapper's
    per-head output slices are lane-dense copies.
    """
    w_b, b_b = backbone_params
    d_in, h = int(w_b.shape[0]), int(w_b.shape[1])

    head_dims, head_offsets, w_chunks, b_chunks = [], [], [], []
    off = 0
    for w_i, b_i in head_params:
        od = int(w_i.shape[1])
        od_pad = _round_up(od, LANE)
        head_dims.append(od)
        head_offsets.append(off)
        w_chunks.append(jnp.pad(w_i.astype(jnp.bfloat16),
                                ((0, 0), (0, od_pad - od))))
        b_chunks.append(jnp.pad(jnp.reshape(b_i, (1, -1)).astype(jnp.float32),
                                ((0, 0), (0, od_pad - od))))
        off += od_pad

    return {
        "w_b": w_b.astype(jnp.bfloat16),
        "b_b": jnp.reshape(b_b, (1, -1)).astype(jnp.float32),
        "w_h": jnp.concatenate(w_chunks, axis=1),   # (H, N_pad) bf16
        "b_h": jnp.concatenate(b_chunks, axis=1),   # (1, N_pad) f32
        "head_dims": tuple(head_dims),
        "head_offsets": tuple(head_offsets),
        "dims": (d_in, h, off),                      # (D_in, H, N_pad)
    }


def _pick_batch_tile(batch: int):
    """Return (tm, padded_batch).

    * batch <= 16: a single full-extent tile (exempt from (8,128) rule).
    * otherwise : >= 2 grid steps (so v7x's two TensorCores both get work)
      and tiles up to 512 rows (amortize per-step overhead, fill the 256-wide
      MXU on v6e/v7x).
    """
    if batch <= 16:
        return batch, batch
    tm = min(512, _round_up(-(-batch // 2), 16))
    return tm, _round_up(batch, tm)


def _build_call(tm, b_pad, d_in, h, n_pad, out_dtype, flops, bytes_accessed,
                single_buffer_weights):
    def resident(shape):
        if single_buffer_weights:
            # Constant index_map -> one VMEM buffer is enough; halves the
            # resident-weight footprint (matters most on v7x's 64 MiB VMEM).
            return pl.BlockSpec(shape, lambda i: (0, 0),
                                pipeline_mode=pl.Buffered(1))
        return pl.BlockSpec(shape, lambda i: (0, 0))

    out_itemsize = jnp.dtype(out_dtype).itemsize
    nbuf_w = 1 if single_buffer_weights else 2
    vmem_bytes = (
        2 * tm * max(d_in, LANE) * 2                  # x tile (double-buffered)
        + 2 * tm * n_pad * out_itemsize               # out tile (double-buffered)
        + nbuf_w * (d_in * max(h, LANE) * 2           # backbone W
                    + max(h, LANE) * n_pad * 2        # fused head W
                    + 8 * max(h, LANE) * 4            # backbone bias (sublane pad)
                    + 8 * n_pad * 4)                  # fused head bias
    )
    vmem_limit = min(64 * 1024 * 1024,
                     max(32 * 1024 * 1024, int(1.25 * vmem_bytes)))

    return pl.pallas_call(
        _vanilla_mtl_kernel,
        grid=(b_pad // tm,),
        in_specs=[
            pl.BlockSpec((tm, d_in), lambda i: (i, 0)),   # x batch tile
            resident((d_in, h)),                          # backbone W (resident)
            resident((1, h)),                             # backbone b
            resident((h, n_pad)),                         # fused head W (resident)
            resident((1, n_pad)),                         # fused head b
        ],
        out_specs=pl.BlockSpec((tm, n_pad), lambda i: (i, 0)),
        out_shape=jax.ShapeDtypeStruct((b_pad, n_pad), out_dtype),
        compiler_params=pltpu.CompilerParams(
            dimension_semantics=("parallel",),
            vmem_limit_bytes=vmem_limit),
        cost_estimate=pl.CostEstimate(flops=flops, transcendentals=0,
                                      bytes_accessed=bytes_accessed),
    )


def vanilla_mtl_forward(x, prepped, out_dtype=jnp.float32):
    """Fused VanillaMTL eval-mode forward.

    Args:
      x: (B, D_in) float32 (or bf16)
      prepped: output of prepare_vanilla_mtl_params (built once, reused)
      out_dtype: dtype of the fused kernel output (bf16 halves HBM writeback)

    Returns:
      (preds, extra_out): preds is a list of (B, O_i) arrays, extra_out == []
      (mirrors the PyTorch module's return structure).
    """
    batch, d_in = int(x.shape[0]), int(x.shape[1])
    d_in_p, h, n_pad = prepped["dims"]
    assert d_in == d_in_p, "input feature dim mismatch"
    head_dims = prepped["head_dims"]
    head_offsets = prepped["head_offsets"]

    tm, b_pad = _pick_batch_tile(batch)
    x_p = x.astype(jnp.bfloat16)
    if b_pad != batch:
        x_p = jnp.pad(x_p, ((0, b_pad - batch), (0, 0)))

    n_real = int(sum(head_dims))
    flops = 2 * batch * (d_in * h + h * n_real)
    bytes_accessed = int(batch * d_in * 2 + d_in * h * 2 + h * n_real * 2
                         + (h + n_real) * 4
                         + batch * n_real * jnp.dtype(out_dtype).itemsize)

    args = (x_p, prepped["w_b"], prepped["b_b"], prepped["w_h"], prepped["b_h"])
    try:
        out = _build_call(tm, b_pad, d_in, h, n_pad, out_dtype, flops,
                          bytes_accessed, single_buffer_weights=True)(*args)
    except Exception:
        # Fallback for jax versions where pl.Buffered(1) is not accepted by
        # the TPU grid pipeline; default double buffering is still correct.
        out = _build_call(tm, b_pad, d_in, h, n_pad, out_dtype, flops,
                          bytes_accessed, single_buffer_weights=False)(*args)

    # Per-head slices (128-lane-aligned -> lane-dense copies); strip padding.
    preds = [out[:batch, off:off + od]
             for od, off in zip(head_dims, head_offsets)]
    extra_out = []  # plain-tensor backbone/heads -> no extra outputs
    return preds, extra_out


def _init_params(key, in_dim, rep_dim, head_dims):
    """Deterministic parameter init (uniform fan-in, like nn.Linear default)."""
    keys = jax.random.split(key, 2 + 2 * len(head_dims))
    lim_b = 1.0 / jnp.sqrt(in_dim)
    w_b = jax.random.uniform(keys[0], (in_dim, rep_dim), jnp.float32, -lim_b, lim_b)
    b_b = jax.random.uniform(keys[1], (1, rep_dim), jnp.float32, -lim_b, lim_b)
    head_params = []
    lim_h = 1.0 / jnp.sqrt(rep_dim)
    for i, od in enumerate(head_dims):
        w_i = jax.random.uniform(keys[2 + 2 * i], (rep_dim, od), jnp.float32, -lim_h, lim_h)
        b_i = jax.random.uniform(keys[3 + 2 * i], (1, od), jnp.float32, -lim_h, lim_h)
        head_params.append((w_i, b_i))
    return (w_b, b_b), head_params


if __name__ == "__main__":
    B, D_IN, REP, HEAD_DIMS = 8, 32, 64, (16, 8)

    key = jax.random.PRNGKey(0)
    kx, kp = jax.random.split(key)
    x = jax.random.normal(kx, (B, D_IN), jnp.float32)
    backbone_params, head_params = _init_params(kp, D_IN, REP, HEAD_DIMS)

    # One-time prep (hoisted out of the per-call path), then the fused forward.
    prepped = prepare_vanilla_mtl_params(backbone_params, head_params)
    preds, extra_out = vanilla_mtl_forward(x, prepped)
    preds = [jax.block_until_ready(p) for p in preds]

    # Pure-JAX reference matching the kernel's bf16-operand / f32-accumulate path.
    w_b, b_b = backbone_params
    xb = x.astype(jnp.bfloat16).astype(jnp.float32)
    wbb = w_b.astype(jnp.bfloat16).astype(jnp.float32)
    rep_ref = jnp.maximum(xb @ wbb + b_b.reshape(1, -1), 0.0)
    rep_bf = rep_ref.astype(jnp.bfloat16).astype(jnp.float32)
    for p, (w_i, b_i) in zip(preds, head_params):
        ref = rep_bf @ w_i.astype(jnp.bfloat16).astype(jnp.float32) + b_i.reshape(1, -1)
        assert p.shape == ref.shape, "shape mismatch vs reference"
        assert jnp.allclose(p, ref, atol=2e-3, rtol=2e-3), "mismatch vs reference"

    assert extra_out == []
    print("KERNEL_OK")
</pallas_src>

<mosaic_0001>
module attributes {stable_mosaic.version = 11 : i64} {
  func.func @_vanilla_mtl_kernel(%arg0: i32, %arg1: memref<8x32xbf16, #tpu.memory_space<vmem>>, %arg2: memref<32x64xbf16, #tpu.memory_space<vmem>>, %arg3: memref<1x64xf32, #tpu.memory_space<vmem>>, %arg4: memref<64x256xbf16, #tpu.memory_space<vmem>>, %arg5: memref<1x256xf32, #tpu.memory_space<vmem>>, %arg6: memref<8x256xf32, #tpu.memory_space<vmem>>) attributes {dimension_semantics = [#tpu.dimension_semantics<parallel>], iteration_bounds = array<i64: 1>, scalar_prefetch = 0 : i64, scratch_operands = 0 : i64, tpu.core_type = #tpu.core_type<tc>, window_params = [{transform_indices = @transform_0, window_bounds = array<i64: 8, 32>}, {pipeline_mode = #tpu.pipeline_mode<synchronous>, transform_indices = @transform_1, window_bounds = array<i64: 32, 64>}, {pipeline_mode = #tpu.pipeline_mode<synchronous>, transform_indices = @transform_2, window_bounds = array<i64: 1, 64>}, {pipeline_mode = #tpu.pipeline_mode<synchronous>, transform_indices = @transform_3, window_bounds = array<i64: 64, 256>}, {pipeline_mode = #tpu.pipeline_mode<synchronous>, transform_indices = @transform_4, window_bounds = array<i64: 1, 256>}, {transform_indices = @transform_5, window_bounds = array<i64: 8, 256>}]} {
    %c0 = arith.constant 0 : index
    %c0_0 = arith.constant 0 : index
    %0 = vector.load %arg1[%c0, %c0_0] : memref<8x32xbf16, #tpu.memory_space<vmem>>, vector<8x32xbf16>
    %c0_1 = arith.constant 0 : index
    %c0_2 = arith.constant 0 : index
    %1 = vector.load %arg2[%c0_1, %c0_2] : memref<32x64xbf16, #tpu.memory_space<vmem>>, vector<32x64xbf16>
    %cst = arith.constant dense<0.000000e+00> : vector<8x64xf32>
    %2 = tpu.matmul %0, %1, %cst {dimension_numbers = #tpu.dot_dimension_numbers<[1], [0], [0], [1], [0, 0, 1, 1], [], []>} : vector<8x32xbf16>, vector<32x64xbf16>, vector<8x64xf32> -> vector<8x64xf32>
    %c0_3 = arith.constant 0 : index
    %c0_4 = arith.constant 0 : index
    %3 = vector.load %arg3[%c0_3, %c0_4] : memref<1x64xf32, #tpu.memory_space<vmem>>, vector<1x64xf32>
    %4 = vector.broadcast %3 : vector<1x64xf32> to vector<8x64xf32>
    %5 = arith.addf %2, %4 : vector<8x64xf32>
    %cst_5 = arith.constant 0.000000e+00 : f32
    %6 = vector.broadcast %cst_5 : f32 to vector<8x64xf32>
    %7 = arith.maximumf %5, %6 : vector<8x64xf32>
    %8 = arith.truncf %7 : vector<8x64xf32> to vector<8x64xbf16>
    %c0_6 = arith.constant 0 : index
    %c0_7 = arith.constant 0 : index
    %9 = vector.load %arg4[%c0_6, %c0_7] : memref<64x256xbf16, #tpu.memory_space<vmem>>, vector<64x256xbf16>
    %cst_8 = arith.constant dense<0.000000e+00> : vector<8x256xf32>
    %10 = tpu.matmul %8, %9, %cst_8 {dimension_numbers = #tpu.dot_dimension_numbers<[1], [0], [0], [1], [0, 0, 1, 1], [], []>} : vector<8x64xbf16>, vector<64x256xbf16>, vector<8x256xf32> -> vector<8x256xf32>
    %c0_9 = arith.constant 0 : index
    %c0_10 = arith.constant 0 : index
    %11 = vector.load %arg5[%c0_9, %c0_10] : memref<1x256xf32, #tpu.memory_space<vmem>>, vector<1x256xf32>
    %12 = vector.broadcast %11 : vector<1x256xf32> to vector<8x256xf32>
    %13 = arith.addf %10, %12 : vector<8x256xf32>
    %c0_11 = arith.constant 0 : index
    %c0_12 = arith.constant 0 : index
    %14 = vector.load %arg6[%c0_11, %c0_12] : memref<8x256xf32, #tpu.memory_space<vmem>>, vector<8x256xf32>
    tpu.vector_store %arg6[%c0_11, %c0_12], %13 {strides = array<i32>} : memref<8x256xf32, #tpu.memory_space<vmem>>, vector<8x256xf32>,
    return
  }
  func.func @transform_0(%arg0: i32) -> (i32, i32) {
    %c0_i32 = arith.constant 0 : i32
    %c0_i32_0 = arith.constant 0 : i32
    return %arg0, %c0_i32 : i32, i32
  }
  func.func @transform_1(%arg0: i32) -> (i32, i32) {
    %c0_i32 = arith.constant 0 : i32
    %c0_i32_0 = arith.constant 0 : i32
    %c0_i32_1 = arith.constant 0 : i32
    return %c0_i32, %c0_i32_0 : i32, i32
  }
  func.func @transform_2(%arg0: i32) -> (i32, i32) {
    %c0_i32 = arith.constant 0 : i32
    %c0_i32_0 = arith.constant 0 : i32
    %c0_i32_1 = arith.constant 0 : i32
    return %c0_i32, %c0_i32_0 : i32, i32
  }
  func.func @transform_3(%arg0: i32) -> (i32, i32) {
    %c0_i32 = arith.constant 0 : i32
    %c0_i32_0 = arith.constant 0 : i32
    %c0_i32_1 = arith.constant 0 : i32
    return %c0_i32, %c0_i32_0 : i32, i32
  }
  func.func @transform_4(%arg0: i32) -> (i32, i32) {
    %c0_i32 = arith.constant 0 : i32
    %c0_i32_0 = arith.constant 0 : i32
    %c0_i32_1 = arith.constant 0 : i32
    return %c0_i32, %c0_i32_0 : i32, i32
  }
  func.func @transform_5(%arg0: i32) -> (i32, i32) {
    %c0_i32 = arith.constant 0 : i32
    %c0_i32_0 = arith.constant 0 : i32
    return %arg0, %c0_i32 : i32, i32
  }
}

module attributes {stable_mosaic.version = 11 : i64} {
  func.func @_vanilla_mtl_kernel(%arg0: i32, %arg1: memref<8x32xbf16, #tpu.memory_space<vmem>>, %arg2: memref<32x64xbf16, #tpu.memory_space<vmem>>, %arg3: memref<1x64xf32, #tpu.memory_space<vmem>>, %arg4: memref<64x256xbf16, #tpu.memory_space<vmem>>, %arg5: memref<1x256xf32, #tpu.memory_space<vmem>>, %arg6: memref<8x256xf32, #tpu.memory_space<vmem>>) attributes {dimension_semantics = [#tpu.dimension_semantics<parallel>], iteration_bounds = array<i64: 1>, scalar_prefetch = 0 : i64, scratch_operands = 0 : i64, tpu.core_type = #tpu.core_type<tc>, window_params = [{transform_indices = @transform_0, window_bounds = array<i64: 8, 32>}, {pipeline_mode = #tpu.pipeline_mode<synchronous>, transform_indices = @transform_1, window_bounds = array<i64: 32, 64>}, {pipeline_mode = #tpu.pipeline_mode<synchronous>, transform_indices = @transform_2, window_bounds = array<i64: 1, 64>}, {pipeline_mode = #tpu.pipeline_mode<synchronous>, transform_indices = @transform_3, window_bounds = array<i64: 64, 256>}, {pipeline_mode = #tpu.pipeline_mode<synchronous>, transform_indices = @transform_4, window_bounds = array<i64: 1, 256>}, {transform_indices = @transform_5, window_bounds = array<i64: 8, 256>}]} {
    %c0 = arith.constant 0 : index
    %c0_0 = arith.constant 0 : index
    %0 = vector.load %arg1[%c0, %c0_0] : memref<8x32xbf16, #tpu.memory_space<vmem>>, vector<8x32xbf16>
    %c0_1 = arith.constant 0 : index
    %c0_2 = arith.constant 0 : index
    %1 = vector.load %arg2[%c0_1, %c0_2] : memref<32x64xbf16, #tpu.memory_space<vmem>>, vector<32x64xbf16>
    %cst = arith.constant dense<0.000000e+00> : vector<8x64xf32>
    %2 = tpu.matmul %0, %1, %cst {dimension_numbers = #tpu.dot_dimension_numbers<[1], [0], [0], [1], [0, 0, 1, 1], [], []>} : vector<8x32xbf16>, vector<32x64xbf16>, vector<8x64xf32> -> vector<8x64xf32>
    %c0_3 = arith.constant 0 : index
    %c0_4 = arith.constant 0 : index
    %3 = vector.load %arg3[%c0_3, %c0_4] : memref<1x64xf32, #tpu.memory_space<vmem>>, vector<1x64xf32>
    %4 = vector.broadcast %3 : vector<1x64xf32> to vector<8x64xf32>
    %5 = arith.addf %2, %4 : vector<8x64xf32>
    %cst_5 = arith.constant 0.000000e+00 : f32
    %6 = vector.broadcast %cst_5 : f32 to vector<8x64xf32>
    %7 = arith.maximumf %5, %6 : vector<8x64xf32>
    %8 = arith.truncf %7 : vector<8x64xf32> to vector<8x64xbf16>
    %c0_6 = arith.constant 0 : index
    %c0_7 = arith.constant 0 : index
    %9 = vector.load %arg4[%c0_6, %c0_7] : memref<64x256xbf16, #tpu.memory_space<vmem>>, vector<64x256xbf16>
    %cst_8 = arith.constant dense<0.000000e+00> : vector<8x256xf32>
    %10 = tpu.matmul %8, %9, %cst_8 {dimension_numbers = #tpu.dot_dimension_numbers<[1], [0], [0], [1], [0, 0, 1, 1], [], []>} : vector<8x64xbf16>, vector<64x256xbf16>, vector<8x256xf32> -> vector<8x256xf32>
    %c0_9 = arith.constant 0 : index
    %c0_10 = arith.constant 0 : index
    %11 = vector.load %arg5[%c0_9, %c0_10] : memref<1x256xf32, #tpu.memory_space<vmem>>, vector<1x256xf32>
    %12 = vector.broadcast %11 : vector<1x256xf32> to vector<8x256xf32>
    %13 = arith.addf %10, %12 : vector<8x256xf32>
    %c0_11 = arith.constant 0 : index
    %c0_12 = arith.constant 0 : index
    %14 = vector.load %arg6[%c0_11, %c0_12] : memref<8x256xf32, #tpu.memory_space<vmem>>, vector<8x256xf32>
    tpu.vector_store %arg6[%c0_11, %c0_12], %13 {strides = array<i32>} : memref<8x256xf32, #tpu.memory_space<vmem>>, vector<8x256xf32>,
    return
  }
  func.func @transform_0(%arg0: i32) -> (i32, i32) {
    %c0_i32 = arith.constant 0 : i32
    %c0_i32_0 = arith.constant 0 : i32
    return %arg0, %c0_i32 : i32, i32
  }
  func.func @transform_1(%arg0: i32) -> (i32, i32) {
    %c0_i32 = arith.constant 0 : i32
    %c0_i32_0 = arith.constant 0 : i32
    %c0_i32_1 = arith.constant 0 : i32
    return %c0_i32, %c0_i32_0 : i32, i32
  }
  func.func @transform_2(%arg0: i32) -> (i32, i32) {
    %c0_i32 = arith.constant 0 : i32
    %c0_i32_0 = arith.constant 0 : i32
    %c0_i32_1 = arith.constant 0 : i32
    return %c0_i32, %c0_i32_0 : i32, i32
  }
  func.func @transform_3(%arg0: i32) -> (i32, i32) {
    %c0_i32 = arith.constant 0 : i32
    %c0_i32_0 = arith.constant 0 : i32
    %c0_i32_1 = arith.constant 0 : i32
    return %c0_i32, %c0_i32_0 : i32, i32
  }
  func.func @transform_4(%arg0: i32) -> (i32, i32) {
    %c0_i32 = arith.constant 0 : i32
    %c0_i32_0 = arith.constant 0 : i32
    %c0_i32_1 = arith.constant 0 : i32
    return %c0_i32, %c0_i32_0 : i32, i32
  }
  func.func @transform_5(%arg0: i32) -> (i32, i32) {
    %c0_i32 = arith.constant 0 : i32
    %c0_i32_0 = arith.constant 0 : i32
    return %arg0, %c0_i32 : i32, i32
  }
}

</mosaic_0001>

<bundles_post_ra>
// kernel: tpu_custom_call.1
= control target key start
LH: loop header
LB: loop body
LE: loop exit
PB: predicated region body
PF: predicated region fallthrough
CT: control target
= control target key end

     0   :  { %10 = vsyncpa [#allocation3], 0  ;;  %s492_s0 = inlined_call_operand.hbm [shape: bf16[8,32], index: 0, kind: input, shape index: {}]   ;;  %s493_s1 = inlined_call_operand.hbm [shape: bf16[32,64], index: 1, kind: input, shape index: {}]   ;;  %s494_s2 = inlined_call_operand.vmem [shape: f32[1,64], index: 2, kind: input, shape index: {}]   ;;  %s495_s3 = inlined_call_operand.hbm [shape: bf16[64,256], index: 3, kind: input, shape index: {}]   ;;  %s496_s4 = inlined_call_operand.vmem [shape: f32[1,256], index: 4, kind: input, shape index: {}]   ;;  %s497_s5 = inlined_call_operand.hbm [shape: f32[8,256], index: 5, kind: output, shape index: {}]  }
   0x1   :  { %11 = vsyncpa [#allocation6], 0 }
   0x2   :  { %12 = vsyncpa [#allocation4], 0  ;;  %s397_s18 = smov [#allocation5]   ;;  %s303_s22 = scalar_lea.hbm %s493_s1, 256 }
   0x3   :  { %s28_s19 = sshll.u32 %s397_s18, 4  ;;  %p304_p0 = scmp.ne.s32.totalorder %s493_s1, %s303_s22  ;;  %s29_s19 = int_to_ptr.vmem [resolvable:$true] %s28_s19 }
   0x4   :  { %p307_p1 = scmp.lt.u32.totalorder %s303_s22, %s493_s1 }
   0x6   :  { %p309_p2 = pnand %p307_p1, %p304_p0 }
   0x8   :  { %312 = shalt.err (!%p309_p2)
}
   0x9   :  { %s313_s27 = scalar_lea.vmem %s29_s19, 256  ;;  %p318_p4 = scmp.lt.s32.totalorder %s29_s19, %s29_s19 }
   0xa   :  { %p314_p3 = scmp.ne.s32.totalorder %s29_s19, %s313_s27  ;;  %p319_p5 = scmp.lt.s32.totalorder %s313_s27, %s313_s27 }
   0xc   :  { %p320_p6 = por %p319_p5, %p318_p4 }
   0xe   :  { %p321_p7 = pnand %p320_p6, %p314_p3 }
  0x10   :  { %324 = shalt.err (!%p321_p7)
}
  0x11   :  { %s398_s28 = smov 64   ;;  %s399_s29 = smov 4  }
  0x12   :  { %34 = dma.hbm_to_vmem [thread:$0]  %s493_s1, 256, %s29_s19, [#allocation6], %s398_s28, %s398_s28, %s399_s29  }
  0x13   :  { %s400_s7 = smov [#allocation2]   ;;  %s401_s9 = smov [#allocation7]  }
  0x14   :  { %s19_s8 = sshll.u32 %s400_s7, 4  ;;  %s42_s10 = sshll.u32 %s401_s9, 4  ;;  %s20_s8 = int_to_ptr.vmem [resolvable:$true] %s19_s8  ;;  %s43_s10 = int_to_ptr.vmem [resolvable:$true] %s42_s10 }
  0x15   :  { %s325_s13 = scalar_lea.hbm %s492_s0, 64 }
  0x16   :  { %p326_p8 = scmp.ne.s32.totalorder %s492_s0, %s325_s13  ;;  %p329_p9 = scmp.lt.u32.totalorder %s325_s13, %s492_s0 }
  0x18   :  { %p331_p10 = pnand %p329_p9, %p326_p8 }
  0x1a   :  { %334 = shalt.err (!%p331_p10)
}
  0x1b   :  { %s335_s1 = scalar_lea.vmem %s20_s8, 64  ;;  %p340_p12 = scmp.lt.s32.totalorder %s20_s8, %s20_s8 }
  0x1c   :  { %p336_p11 = scmp.ne.s32.totalorder %s20_s8, %s335_s1  ;;  %p341_p13 = scmp.lt.s32.totalorder %s335_s1, %s335_s1 }
  0x1e   :  { %p342_p0 = por %p341_p13, %p340_p12 }
  0x20   :  { %p343_p1 = pnand %p342_p0, %p336_p11 }
  0x22   :  { %346 = shalt.err (!%p343_p1)
}
  0x23   :  { %22 = dma.hbm_to_vmem [thread:$0]  %s492_s0, 64, %s20_s8, [#allocation3]  }
  0x24   :  { %s347_s22 = scalar_lea.hbm %s495_s3, 1024 }
  0x25   :  { %p348_p2 = scmp.ne.s32.totalorder %s495_s3, %s347_s22  ;;  %p351_p3 = scmp.lt.u32.totalorder %s347_s22, %s495_s3 }
  0x27   :  { %p353_p4 = pnand %p351_p3, %p348_p2 }
  0x29   :  { %356 = shalt.err (!%p353_p4)
}
  0x2a   :  { %s357_s27 = scalar_lea.vmem %s43_s10, 1024  ;;  %p362_p6 = scmp.lt.s32.totalorder %s43_s10, %s43_s10 }
  0x2b   :  { %p358_p5 = scmp.ne.s32.totalorder %s43_s10, %s357_s27  ;;  %p363_p7 = scmp.lt.s32.totalorder %s357_s27, %s357_s27 }
  0x2d   :  { %p364_p8 = por %p363_p7, %p362_p6 }
  0x2f   :  { %p365_p9 = pnand %p364_p8, %p358_p5 }
  0x31   :  { %368 = shalt.err (!%p365_p9)
}
  0x32   :  { %s402_s0 = smov 128   ;;  %s403_s28 = smov 8  }
  0x33   :  { %48 = dma.hbm_to_vmem [thread:$0]  %s495_s3, 1024, %s43_s10, [#allocation6], %s402_s0, %s402_s0, %s403_s28  }
  0x34   :  { %391 = dma.done.wait [#allocation3], 64  }
  0x35   :  { %392 = vsyncadd [#allocation3], 4294967232 }
  0x36   :  { %393 = dma.done.wait [#allocation6], 1280  }
  0x37   :  { %394 = vsyncadd [#allocation6], 4294966016  ;;  %v404_v0 = vmov 0.0   ;;  %vm405_vm0 = vmmov 0   ;;  %v289_v1 = vld [vmem:[#allocation5] sm:$0xff]   ;;  %v290_v2 = vld [vmem:[#allocation5 + $0x8] sm:$0xff]   ;;  %v141_v21 = vlaneseq }
  0x38   :  { %270 = vmatprep.subr.bf16.mxu0 %v404_v0  ;;  %274 = vmatprep.mubr.msk.bf16.mxu0 %vm405_vm0, %v404_v0  ;;  %v291_v3 = vld [vmem:[#allocation7 + $0x4] ss:$8 sps:$4 sm:$0xff]   ;;  %v293_v4 = vld [vmem:[#allocation7] ss:$8 sps:$4 sm:$0xff]   ;;  %v294_v5 = vld [vmem:[#allocation7 + $0x14] ss:$8 sps:$4 sm:$0xff]  }
  0x39   :  { %271 = vmatpush3.bf16.msra.mxu0 %v289_v1  ;;  %v61_v6 = vld [vmem:[#allocation2] sm:$0xf]  ;;  %195 = vmatprep.subr.bf16.mxu1 %v291_v3  ;;  %vm85_vm1 = vcmask 261120   ;;  %v296_v7 = vld [vmem:[#allocation7 + $0x10] ss:$8 sps:$4 sm:$0xff]   ;;  %v406_v12 = vmov 0  }
  0x3a   :  { %272 = vmatprep.subr.bf16.mxu0 %v404_v0  ;;  %196 = vmatpush1.bf16.msra.mxu1 %v293_v4  ;;  %v297_v8 = vld [vmem:[#allocation7 + $0x24] ss:$8 sps:$4 sm:$0xff]   ;;  %v299_v9 = vld [vmem:[#allocation7 + $0x20] ss:$8 sps:$4 sm:$0xff]   ;;  %v300_v10 = vld [vmem:[#allocation7 + $0x34] ss:$8 sps:$4 sm:$0xff]  }
  0x3b   :  { %197 = vmatprep.subr.bf16.mxu1 %v294_v5  ;;  %v302_v11 = vld [vmem:[#allocation7 + $0x30] ss:$8 sps:$4 sm:$0xff]   ;;  %227 = vmatprep.mubr.bf16.mxu1 %v406_v12  ;;  %v254_v13 = vld [vmem:[%s494_s2] ss:$0 sm:$0xff]  ;;  %vm191_vm2 = vcmask 523264   ;;  %v142_v22 = vshrl.u32 %v141_v21, 7 }
  0x3c   :  { %v139_v24 = vld [vmem:[%s496_s4] sm:$0x3]  ;;  %s407_s2 = smov [#allocation8]  }
  0x3d   :  { %273 = vmatpush3.bf16.msra.mxu0 %v290_v2  ;;  %v143_v23 = vsub.s32 0, %v142_v22  ;;  %v147_v25 = vsub.s32 1, %v142_v22  ;;  %s244_s9 = sshll.u32 %s407_s2, 4  ;;  %s245_s9 = int_to_ptr.vmem [resolvable:$true] %s244_s9 }
  0x3e   :  { %198 = vmatpush1.bf16.msra.mxu1 %v296_v7  ;;  %s369_s10 = scalar_lea.vmem %s245_s9, 256  ;;  %p374_p11 = scmp.lt.s32.totalorder %s245_s9, %s245_s9 }
  0x3f   :  { %199 = vmatprep.subr.bf16.mxu1 %v297_v8  ;;  %v144_v26 = vrot.slane %v139_v24, %v143_v23  ;;  %v148_v27 = vrot.slane %v139_v24, %v147_v25  ;;  %p370_p10 = scmp.ne.s32.totalorder %s245_s9, %s369_s10  ;;  %p375_p12 = scmp.lt.s32.totalorder %s369_s10, %s369_s10 }
  0x40   :  { %275 = vmatmul.mubr.msk.bf16.vlgmr.msra.gmra.mrb[0].mxu0 %vm85_vm1, %v61_v6 }
  0x41   :  { %p376_p13 = por %p375_p12, %p374_p11 }
  0x42   :  { %200 = vmatpush1.bf16.msra.mxu1 %v299_v9 }
  0x43   :  { %201 = vmatprep.subr.bf16.mxu1 %v300_v10  ;;  %p377_p0 = pnand %p376_p13, %p370_p10 }
  0x46   :  { %202 = vmatpush1.bf16.msra.mxu1 %v302_v11 }
 0x113   :  { %v123_v14 = vpop.f32.mrb[0].mxu0 }
 0x114   :  { %v124_v15 = vadd.f32 %v254_v13, %v123_v14  ;;  %v276_v16 = vpop.f32.mrb[1].mxu0 }
 0x115   :  { %v126_v17 = vpop.f32.mrb[2].mxu0 }
 0x116   :  { %v129_v18 = vmax.f32 %v124_v15, 0.0  ;;  %v277_v19 = vpop.f32.mrb[3].mxu0 }
 0x118   :  { %v130_v20 = vpack.c.bf16 %v129_v18, %v129_v18 }
 0x11a   :  { %266 = vmatmul.mubr.msk.bf16.vlgmr.msra.gmra.mrb[0].mxu1 %vm191_vm2, %v130_v20 }
 0x1ed   :  { %v229_v28 = vpop.f32.mrb[0].mxu1 }
 0x1ee   :  { %v230_v29 = vadd.f32 %v229_v28, %v144_v26  ;;  %v231_v30 = vpop.f32.mrb[1].mxu1 }
 0x1ef   :  { %v232_v31 = vadd.f32 %v231_v30, %v148_v27  ;;  %v233_v32 = vpop.f32.mrb[2].mxu1 }
 0x1f0   :  { %236 = vst [vmem:[#allocation8] sm:$0xff] %v230_v29  ;;  %v234_v33 = vpop.f32.mrb[3].mxu1 }
 0x1f1   :  { %237 = vst [vmem:[#allocation8 + $0x8] sm:$0xff] %v232_v31 }
 0x1f2   :  { %380 = shalt.err (!%p377_p0)
}
 0x1f3   :  { %s381_s12 = scalar_lea.hbm %s497_s5, 256 }
 0x1f4   :  { %p382_p1 = scmp.ne.s32.totalorder %s497_s5, %s381_s12  ;;  %p385_p2 = scmp.lt.u32.totalorder %s381_s12, %s497_s5 }
 0x1f6   :  { %p387_p3 = pnand %p385_p2, %p382_p1 }
 0x1f8   :  { %390 = shalt.err (!%p387_p3)
}
 0x1f9   :  { %247 = dma.vmem_to_hbm [thread:$0]  %s245_s9, 256, %s497_s5, [#allocation4]  }
 0x1fa   :  { %395 = dma.done.wait [#allocation4], 256  }
 0x1fb   :  { %396 = vsyncadd [#allocation4], 4294967040 }
 0x1fc   :  { %251 = vsyncpa [#allocation3], 1 }
 0x1fd   :  { %252 = vsyncpa [#allocation6], 1 }
 0x1fe   :  { %253 = vsyncpa [#allocation4], 1 }

// kernel: tpu_custom_call.1
= control target key start
LH: loop header
LB: loop body
LE: loop exit
PB: predicated region body
PF: predicated region fallthrough
CT: control target
= control target key end

     0   :  { %10 = vsyncpa [#allocation3], 0  ;;  %s492_s0 = inlined_call_operand.hbm [shape: bf16[8,32], index: 0, kind: input, shape index: {}]   ;;  %s493_s1 = inlined_call_operand.hbm [shape: bf16[32,64], index: 1, kind: input, shape index: {}]   ;;  %s494_s2 = inlined_call_operand.vmem [shape: f32[1,64], index: 2, kind: input, shape index: {}]   ;;  %s495_s3 = inlined_call_operand.hbm [shape: bf16[64,256], index: 3, kind: input, shape index: {}]   ;;  %s496_s4 = inlined_call_operand.vmem [shape: f32[1,256], index: 4, kind: input, shape index: {}]   ;;  %s497_s5 = inlined_call_operand.hbm [shape: f32[8,256], index: 5, kind: output, shape index: {}]  }
   0x1   :  { %11 = vsyncpa [#allocation6], 0 }
   0x2   :  { %12 = vsyncpa [#allocation4], 0  ;;  %s397_s18 = smov [#allocation5]   ;;  %s303_s22 = scalar_lea.hbm %s493_s1, 256 }
   0x3   :  { %s28_s19 = sshll.u32 %s397_s18, 4  ;;  %p304_p0 = scmp.ne.s32.totalorder %s493_s1, %s303_s22  ;;  %s29_s19 = int_to_ptr.vmem [resolvable:$true] %s28_s19 }
   0x4   :  { %p307_p1 = scmp.lt.u32.totalorder %s303_s22, %s493_s1 }
   0x6   :  { %p309_p2 = pnand %p307_p1, %p304_p0 }
   0x8   :  { %312 = shalt.err (!%p309_p2)
}
   0x9   :  { %s313_s27 = scalar_lea.vmem %s29_s19, 256  ;;  %p318_p4 = scmp.lt.s32.totalorder %s29_s19, %s29_s19 }
   0xa   :  { %p314_p3 = scmp.ne.s32.totalorder %s29_s19, %s313_s27  ;;  %p319_p5 = scmp.lt.s32.totalorder %s313_s27, %s313_s27 }
   0xc   :  { %p320_p6 = por %p319_p5, %p318_p4 }
   0xe   :  { %p321_p7 = pnand %p320_p6, %p314_p3 }
  0x10   :  { %324 = shalt.err (!%p321_p7)
}
  0x11   :  { %s398_s28 = smov 64   ;;  %s399_s29 = smov 4  }
  0x12   :  { %34 = dma.hbm_to_vmem [thread:$0]  %s493_s1, 256, %s29_s19, [#allocation6], %s398_s28, %s398_s28, %s399_s29  }
  0x13   :  { %s400_s7 = smov [#allocation2]   ;;  %s401_s9 = smov [#allocation7]  }
  0x14   :  { %s19_s8 = sshll.u32 %s400_s7, 4  ;;  %s42_s10 = sshll.u32 %s401_s9, 4  ;;  %s20_s8 = int_to_ptr.vmem [resolvable:$true] %s19_s8  ;;  %s43_s10 = int_to_ptr.vmem [resolvable:$true] %s42_s10 }
  0x15   :  { %s325_s13 = scalar_lea.hbm %s492_s0, 64 }
  0x16   :  { %p326_p8 = scmp.ne.s32.totalorder %s492_s0, %s325_s13  ;;  %p329_p9 = scmp.lt.u32.totalorder %s325_s13, %s492_s0 }
  0x18   :  { %p331_p10 = pnand %p329_p9, %p326_p8 }
  0x1a   :  { %334 = shalt.err (!%p331_p10)
}
  0x1b   :  { %s335_s1 = scalar_lea.vmem %s20_s8, 64  ;;  %p340_p12 = scmp.lt.s32.totalorder %s20_s8, %s20_s8 }
  0x1c   :  { %p336_p11 = scmp.ne.s32.totalorder %s20_s8, %s335_s1  ;;  %p341_p13 = scmp.lt.s32.totalorder %s335_s1, %s335_s1 }
  0x1e   :  { %p342_p0 = por %p341_p13, %p340_p12 }
  0x20   :  { %p343_p1 = pnand %p342_p0, %p336_p11 }
  0x22   :  { %346 = shalt.err (!%p343_p1)
}
  0x23   :  { %22 = dma.hbm_to_vmem [thread:$0]  %s492_s0, 64, %s20_s8, [#allocation3]  }
  0x24   :  { %s347_s22 = scalar_lea.hbm %s495_s3, 1024 }
  0x25   :  { %p348_p2 = scmp.ne.s32.totalorder %s495_s3, %s347_s22  ;;  %p351_p3 = scmp.lt.u32.totalorder %s347_s22, %s495_s3 }
  0x27   :  { %p353_p4 = pnand %p351_p3, %p348_p2 }
  0x29   :  { %356 = shalt.err (!%p353_p4)
}
  0x2a   :  { %s357_s27 = scalar_lea.vmem %s43_s10, 1024  ;;  %p362_p6 = scmp.lt.s32.totalorder %s43_s10, %s43_s10 }
  0x2b   :  { %p358_p5 = scmp.ne.s32.totalorder %s43_s10, %s357_s27  ;;  %p363_p7 = scmp.lt.s32.totalorder %s357_s27, %s357_s27 }
  0x2d   :  { %p364_p8 = por %p363_p7, %p362_p6 }
  0x2f   :  { %p365_p9 = pnand %p364_p8, %p358_p5 }
  0x31   :  { %368 = shalt.err (!%p365_p9)
}
  0x32   :  { %s402_s0 = smov 128   ;;  %s403_s28 = smov 8  }
  0x33   :  { %48 = dma.hbm_to_vmem [thread:$0]  %s495_s3, 1024, %s43_s10, [#allocation6], %s402_s0, %s402_s0, %s403_s28  }
  0x34   :  { %391 = dma.done.wait [#allocation3], 64  }
  0x35   :  { %392 = vsyncadd [#allocation3], 4294967232 }
  0x36   :  { %393 = dma.done.wait [#allocation6], 1280  }
  0x37   :  { %394 = vsyncadd [#allocation6], 4294966016  ;;  %v404_v0 = vmov 0.0   ;;  %vm405_vm0 = vmmov 0   ;;  %v289_v1 = vld [vmem:[#allocation5] sm:$0xff]   ;;  %v290_v2 = vld [vmem:[#allocation5 + $0x8] sm:$0xff]   ;;  %v141_v21 = vlaneseq }
  0x38   :  { %270 = vmatprep.subr.bf16.mxu0 %v404_v0  ;;  %274 = vmatprep.mubr.msk.bf16.mxu0 %vm405_vm0, %v404_v0  ;;  %v291_v3 = vld [vmem:[#allocation7 + $0x4] ss:$8 sps:$4 sm:$0xff]   ;;  %v293_v4 = vld [vmem:[#allocation7] ss:$8 sps:$4 sm:$0xff]   ;;  %v294_v5 = vld [vmem:[#allocation7 + $0x14] ss:$8 sps:$4 sm:$0xff]  }
  0x39   :  { %271 = vmatpush3.bf16.msra.mxu0 %v289_v1  ;;  %v61_v6 = vld [vmem:[#allocation2] sm:$0xf]  ;;  %195 = vmatprep.subr.bf16.mxu1 %v291_v3  ;;  %vm85_vm1 = vcmask 261120   ;;  %v296_v7 = vld [vmem:[#allocation7 + $0x10] ss:$8 sps:$4 sm:$0xff]   ;;  %v406_v12 = vmov 0  }
  0x3a   :  { %272 = vmatprep.subr.bf16.mxu0 %v404_v0  ;;  %196 = vmatpush1.bf16.msra.mxu1 %v293_v4  ;;  %v297_v8 = vld [vmem:[#allocation7 + $0x24] ss:$8 sps:$4 sm:$0xff]   ;;  %v299_v9 = vld [vmem:[#allocation7 + $0x20] ss:$8 sps:$4 sm:$0xff]   ;;  %v300_v10 = vld [vmem:[#allocation7 + $0x34] ss:$8 sps:$4 sm:$0xff]  }
  0x3b   :  { %197 = vmatprep.subr.bf16.mxu1 %v294_v5  ;;  %v302_v11 = vld [vmem:[#allocation7 + $0x30] ss:$8 sps:$4 sm:$0xff]   ;;  %227 = vmatprep.mubr.bf16.mxu1 %v406_v12  ;;  %v254_v13 = vld [vmem:[%s494_s2] ss:$0 sm:$0xff]  ;;  %vm191_vm2 = vcmask 523264   ;;  %v142_v22 = vshrl.u32 %v141_v21, 7 }
  0x3c   :  { %v139_v24 = vld [vmem:[%s496_s4] sm:$0x3]  ;;  %s407_s2 = smov [#allocation8]  }
  0x3d   :  { %273 = vmatpush3.bf16.msra.mxu0 %v290_v2  ;;  %v143_v23 = vsub.s32 0, %v142_v22  ;;  %v147_v25 = vsub.s32 1, %v142_v22  ;;  %s244_s9 = sshll.u32 %s407_s2, 4  ;;  %s245_s9 = int_to_ptr.vmem [resolvable:$true] %s244_s9 }
  0x3e   :  { %198 = vmatpush1.bf16.msra.mxu1 %v296_v7  ;;  %s369_s10 = scalar_lea.vmem %s245_s9, 256  ;;  %p374_p11 = scmp.lt.s32.totalorder %s245_s9, %s245_s9 }
  0x3f   :  { %199 = vmatprep.subr.bf16.mxu1 %v297_v8  ;;  %v144_v26 = vrot.slane %v139_v24, %v143_v23  ;;  %v148_v27 = vrot.slane %v139_v24, %v147_v25  ;;  %p370_p10 = scmp.ne.s32.totalorder %s245_s9, %s369_s10  ;;  %p375_p12 = scmp.lt.s32.totalorder %s369_s10, %s369_s10 }
  0x40   :  { %275 = vmatmul.mubr.msk.bf16.vlgmr.msra.gmra.mrb[0].mxu0 %vm85_vm1, %v61_v6 }
  0x41   :  { %p376_p13 = por %p375_p12, %p374_p11 }
  0x42   :  { %200 = vmatpush1.bf16.msra.mxu1 %v299_v9 }
  0x43   :  { %201 = vmatprep.subr.bf16.mxu1 %v300_v10  ;;  %p377_p0 = pnand %p376_p13, %p370_p10 }
  0x46   :  { %202 = vmatpush1.bf16.msra.mxu1 %v302_v11 }
 0x113   :  { %v123_v14 = vpop.f32.mrb[0].mxu0 }
 0x114   :  { %v124_v15 = vadd.f32 %v254_v13, %v123_v14  ;;  %v276_v16 = vpop.f32.mrb[1].mxu0 }
 0x115   :  { %v126_v17 = vpop.f32.mrb[2].mxu0 }
 0x116   :  { %v129_v18 = vmax.f32 %v124_v15, 0.0  ;;  %v277_v19 = vpop.f32.mrb[3].mxu0 }
 0x118   :  { %v130_v20 = vpack.c.bf16 %v129_v18, %v129_v18 }
 0x11a   :  { %266 = vmatmul.mubr.msk.bf16.vlgmr.msra.gmra.mrb[0].mxu1 %vm191_vm2, %v130_v20 }
 0x1ed   :  { %v229_v28 = vpop.f32.mrb[0].mxu1 }
 0x1ee   :  { %v230_v29 = vadd.f32 %v229_v28, %v144_v26  ;;  %v231_v30 = vpop.f32.mrb[1].mxu1 }
 0x1ef   :  { %v232_v31 = vadd.f32 %v231_v30, %v148_v27  ;;  %v233_v32 = vpop.f32.mrb[2].mxu1 }
 0x1f0   :  { %236 = vst [vmem:[#allocation8] sm:$0xff] %v230_v29  ;;  %v234_v33 = vpop.f32.mrb[3].mxu1 }
 0x1f1   :  { %237 = vst [vmem:[#allocation8 + $0x8] sm:$0xff] %v232_v31 }
 0x1f2   :  { %380 = shalt.err (!%p377_p0)
}
 0x1f3   :  { %s381_s12 = scalar_lea.hbm %s497_s5, 256 }
 0x1f4   :  { %p382_p1 = scmp.ne.s32.totalorder %s497_s5, %s381_s12  ;;  %p385_p2 = scmp.lt.u32.totalorder %s381_s12, %s497_s5 }
 0x1f6   :  { %p387_p3 = pnand %p385_p2, %p382_p1 }
 0x1f8   :  { %390 = shalt.err (!%p387_p3)
}
 0x1f9   :  { %247 = dma.vmem_to_hbm [thread:$0]  %s245_s9, 256, %s497_s5, [#allocation4]  }
 0x1fa   :  { %395 = dma.done.wait [#allocation4], 256  }
 0x1fb   :  { %396 = vsyncadd [#allocation4], 4294967040 }
 0x1fc   :  { %251 = vsyncpa [#allocation3], 1 }
 0x1fd   :  { %252 = vsyncpa [#allocation6], 1 }
 0x1fe   :  { %253 = vsyncpa [#allocation4], 1 }

</bundles_post_ra>
